<compile_context>
chip_gen: v7x
topology: tpu7x:2x2x1
jax: 0.10.0
libtpu: 0.0.40
codegen_flags: <defaults>
</compile_context>

<pallas_src>
import jax
import jax.numpy as jnp
from jax import lax
from jax.experimental import pallas as pl
from jax.experimental.pallas import tpu as pltpu


def _round_up(x: int, m: int) -> int:
    return ((x + m - 1) // m) * m


def laser_linear_kernel(x_ref, w1_ref, w2_ref, b_ref, o_ref, h_ref):
    # Grid = (i: row tiles [parallel], j: output-feature tiles [arbitrary]).
    j = pl.program_id(1)

    # First projection computed once per row tile, reused across all j.
    @pl.when(j == 0)
    def _():
        # x:(tm, in) . W1:(bneck, in) contracted on `in` -> h:(tm, bneck), f32.
        h_ref[...] = lax.dot_general(
            x_ref[...], w1_ref[...],
            dimension_numbers=(((1,), (1,)), ((), ())),
            preferred_element_type=jnp.float32)

    # Second projection: h:(tm, bneck) . W2_tile:(tn, bneck) contracted on
    # bneck -> (tm, tn).  MXU handles the transposed rhs feed directly.
    o = lax.dot_general(
        h_ref[...].astype(w2_ref.dtype), w2_ref[...],
        dimension_numbers=(((1,), (1,)), ((), ())),
        preferred_element_type=jnp.float32)
    o_ref[...] = (o + b_ref[...].astype(jnp.float32)).astype(o_ref.dtype)


def laser_linear(x, w1, w2, bias, *, tm_max=256, tn_max=512):
    """Forward of LaserLinear: laser2(laser1(x)).

    x    : (..., in_features)
    w1   : (bottleneck_features, in_features)   -- laser1.weight (native layout)
    w2   : (out_features, bottleneck_features)  -- laser2.weight (native layout)
    bias : (out_features,) or None              -- laser2.bias
    """
    orig_lead = x.shape[:-1]
    in_features = x.shape[-1]
    bottleneck_features, in_f2 = w1.shape
    out_features, bneck2 = w2.shape
    assert in_f2 == in_features and bneck2 == bottleneck_features

    x2 = x.reshape(-1, in_features)
    M = x2.shape[0]

    # Row tile: 8-aligned, grown up to tm_max; output tile: 128-aligned
    # (lane-dense stores), up to tn_max.
    tm = min(tm_max, _round_up(M, 8))
    tn = min(tn_max, _round_up(out_features, 128))

    m_pad = _round_up(M, tm)
    n_pad = _round_up(out_features, tn)

    if m_pad != M:
        x2 = jnp.pad(x2, ((0, m_pad - M), (0, 0)))
    w2p = w2 if n_pad == out_features else jnp.pad(
        w2, ((0, n_pad - out_features), (0, 0)))
    if bias is None:
        b = jnp.zeros((1, n_pad), dtype=x.dtype)
    else:
        b = bias.astype(x.dtype)
        if n_pad != out_features:
            b = jnp.pad(b, ((0, n_pad - out_features),))
        b = b.reshape(1, n_pad)

    grid = (m_pad // tm, n_pad // tn)

    # Explicit scoped-VMEM budget: double-buffered streamed tiles + resident
    # W1 + f32 h scratch, with 2x headroom (clamped to v7x-safe 64 MiB).
    itemsize = jnp.dtype(x.dtype).itemsize
    est = (2 * tm * in_features * itemsize
           + 2 * in_features * bottleneck_features * itemsize
           + 2 * tn * bottleneck_features * itemsize
           + 2 * tn * itemsize
           + 2 * tm * tn * itemsize
           + tm * bottleneck_features * 4)
    vmem_limit = int(min(max(2 * est, 8 * 1024 * 1024), 64 * 1024 * 1024))

    out_padded = pl.pallas_call(
        laser_linear_kernel,
        out_shape=jax.ShapeDtypeStruct((m_pad, n_pad), x.dtype),
        grid=grid,
        in_specs=[
            # x rows: streamed per row tile, full feature (K) dim.
            pl.BlockSpec((tm, in_features), lambda i, j: (i, 0)),
            # W1 (bneck, in): whole matrix, constant block across the grid.
            pl.BlockSpec((bottleneck_features, in_features),
                         lambda i, j: (0, 0)),
            # W2 (out, bneck): tiled over the output-feature axis.
            pl.BlockSpec((tn, bottleneck_features), lambda i, j: (j, 0)),
            # bias: one lane-dense row tile per output-feature tile.
            pl.BlockSpec((1, tn), lambda i, j: (0, j)),
        ],
        out_specs=pl.BlockSpec((tm, tn), lambda i, j: (i, j)),
        scratch_shapes=[pltpu.VMEM((tm, bottleneck_features), jnp.float32)],
        compiler_params=pltpu.CompilerParams(
            dimension_semantics=("parallel", "arbitrary"),
            vmem_limit_bytes=vmem_limit),
    )(x2, w1, w2p, b)

    out = out_padded[:M, :out_features]
    return out.reshape(*orig_lead, out_features)


if __name__ == "__main__":
    # Small shapes consistent with the module: batch=2, seq=8,
    # in_features=32, bottleneck_features=16, out_features=64, bias=True.
    batch, seq = 2, 8
    in_features, bottleneck_features, out_features = 32, 16, 64

    key = jax.random.PRNGKey(0)
    kx, kw1, kw2, kb = jax.random.split(key, 4)

    x = jax.random.normal(kx, (batch, seq, in_features), dtype=jnp.float32)

    # nn.Linear-style init: U(-1/sqrt(fan_in), 1/sqrt(fan_in)).
    bound1 = 1.0 / (in_features ** 0.5)
    w1 = jax.random.uniform(kw1, (bottleneck_features, in_features),
                            dtype=jnp.float32, minval=-bound1, maxval=bound1)
    bound2 = 1.0 / (bottleneck_features ** 0.5)
    w2 = jax.random.uniform(kw2, (out_features, bottleneck_features),
                            dtype=jnp.float32, minval=-bound2, maxval=bound2)
    bias = jax.random.uniform(kb, (out_features,), dtype=jnp.float32,
                              minval=-bound2, maxval=bound2)

    out = laser_linear(x, w1, w2, bias)
    out = jax.block_until_ready(out)

    # Pure-JAX reference: self.laser2(self.laser1(x)).
    ref = (x @ w1.T) @ w2.T + bias
    assert out.shape == (batch, seq, out_features)
    assert jnp.allclose(out, ref, atol=1e-5, rtol=1e-5), "mismatch vs reference"

    print("KERNEL_OK")
</pallas_src>

<mosaic_0001>
module attributes {stable_mosaic.version = 11 : i64} {
  func.func @laser_linear_kernel(%arg0: i32, %arg1: i32, %arg2: memref<16x32xf32, #tpu.memory_space<vmem>>, %arg3: memref<16x32xf32, #tpu.memory_space<vmem>>, %arg4: memref<128x16xf32, #tpu.memory_space<vmem>>, %arg5: memref<1x128xf32, #tpu.memory_space<vmem>>, %arg6: memref<16x128xf32, #tpu.memory_space<vmem>>, %arg7: memref<16x16xf32, #tpu.memory_space<vmem>>) attributes {dimension_semantics = [#tpu.dimension_semantics<parallel>, #tpu.dimension_semantics<arbitrary>], iteration_bounds = array<i64: 1, 1>, scalar_prefetch = 0 : i64, scratch_operands = 1 : i64, tpu.core_type = #tpu.core_type<tc>, window_params = [{transform_indices = @transform_0, window_bounds = array<i64: 16, 32>}, {pipeline_mode = #tpu.pipeline_mode<synchronous>, transform_indices = @transform_1, window_bounds = array<i64: 16, 32>}, {transform_indices = @transform_2, window_bounds = array<i64: 128, 16>}, {transform_indices = @transform_3, window_bounds = array<i64: 1, 128>}, {transform_indices = @transform_4, window_bounds = array<i64: 16, 128>}]} {
    %c0_i32 = arith.constant 0 : i32
    %0 = arith.cmpi eq, %arg1, %c0_i32 : i32
    %1 = arith.extui %0 : i1 to i32
    %c0_i32_0 = arith.constant 0 : i32
    %2 = arith.cmpi ne, %1, %c0_i32_0 : i32
    scf.if %2 {
      %c0_8 = arith.constant 0 : index
      %c0_9 = arith.constant 0 : index
      %10 = vector.load %arg2[%c0_8, %c0_9] : memref<16x32xf32, #tpu.memory_space<vmem>>, vector<16x32xf32>
      %c0_10 = arith.constant 0 : index
      %c0_11 = arith.constant 0 : index
      %11 = vector.load %arg3[%c0_10, %c0_11] : memref<16x32xf32, #tpu.memory_space<vmem>>, vector<16x32xf32>
      %cst_12 = arith.constant dense<0.000000e+00> : vector<16x16xf32>
      %12 = tpu.matmul %10, %11, %cst_12 {dimension_numbers = #tpu.dot_dimension_numbers<[1], [1], [0], [0], [0, 0, 1, 0], [], []>} : vector<16x32xf32>, vector<16x32xf32>, vector<16x16xf32> -> vector<16x16xf32>
      %c0_13 = arith.constant 0 : index
      %c0_14 = arith.constant 0 : index
      %13 = vector.load %arg7[%c0_13, %c0_14] : memref<16x16xf32, #tpu.memory_space<vmem>>, vector<16x16xf32>
      tpu.vector_store %arg7[%c0_13, %c0_14], %12 {strides = array<i32>} : memref<16x16xf32, #tpu.memory_space<vmem>>, vector<16x16xf32>,
    } else {
    }
    %c0 = arith.constant 0 : index
    %c0_1 = arith.constant 0 : index
    %3 = vector.load %arg7[%c0, %c0_1] : memref<16x16xf32, #tpu.memory_space<vmem>>, vector<16x16xf32>
    %c0_2 = arith.constant 0 : index
    %c0_3 = arith.constant 0 : index
    %4 = vector.load %arg4[%c0_2, %c0_3] : memref<128x16xf32, #tpu.memory_space<vmem>>, vector<128x16xf32>
    %cst = arith.constant dense<0.000000e+00> : vector<16x128xf32>
    %5 = tpu.matmul %3, %4, %cst {dimension_numbers = #tpu.dot_dimension_numbers<[1], [1], [0], [0], [0, 0, 1, 0], [], []>} : vector<16x16xf32>, vector<128x16xf32>, vector<16x128xf32> -> vector<16x128xf32>
    %c0_4 = arith.constant 0 : index
    %c0_5 = arith.constant 0 : index
    %6 = vector.load %arg5[%c0_4, %c0_5] : memref<1x128xf32, #tpu.memory_space<vmem>>, vector<1x128xf32>
    %7 = vector.broadcast %6 : vector<1x128xf32> to vector<16x128xf32>
    %8 = arith.addf %5, %7 : vector<16x128xf32>
    %c0_6 = arith.constant 0 : index
    %c0_7 = arith.constant 0 : index
    %9 = vector.load %arg6[%c0_6, %c0_7] : memref<16x128xf32, #tpu.memory_space<vmem>>, vector<16x128xf32>
    tpu.vector_store %arg6[%c0_6, %c0_7], %8 {strides = array<i32>} : memref<16x128xf32, #tpu.memory_space<vmem>>, vector<16x128xf32>,
    return
  }
  func.func @transform_0(%arg0: i32, %arg1: i32) -> (i32, i32) {
    %c0_i32 = arith.constant 0 : i32
    %c0_i32_0 = arith.constant 0 : i32
    return %arg0, %c0_i32 : i32, i32
  }
  func.func @transform_1(%arg0: i32, %arg1: i32) -> (i32, i32) {
    %c0_i32 = arith.constant 0 : i32
    %c0_i32_0 = arith.constant 0 : i32
    %c0_i32_1 = arith.constant 0 : i32
    return %c0_i32, %c0_i32_0 : i32, i32
  }
  func.func @transform_2(%arg0: i32, %arg1: i32) -> (i32, i32) {
    %c0_i32 = arith.constant 0 : i32
    %c0_i32_0 = arith.constant 0 : i32
    return %arg1, %c0_i32 : i32, i32
  }
  func.func @transform_3(%arg0: i32, %arg1: i32) -> (i32, i32) {
    %c0_i32 = arith.constant 0 : i32
    %c0_i32_0 = arith.constant 0 : i32
    return %c0_i32, %arg1 : i32, i32
  }
  func.func @transform_4(%arg0: i32, %arg1: i32) -> (i32, i32) {
    %c0_i32 = arith.constant 0 : i32
    return %arg0, %arg1 : i32, i32
  }
}

</mosaic_0001>

<bundles_post_ra>
// kernel: tpu_custom_call.1
= control target key start
LH: loop header
LB: loop body
LE: loop exit
PB: predicated region body
PF: predicated region fallthrough
CT: control target
= control target key end

     0   :  { %vm26_vm0 = vcmask 261120   ;;  %vm114_vm1 = vcmask 130048   ;;  %s607_s0 = inlined_call_operand.vmem [shape: f32[16,32], index: 0, kind: input, shape index: {}]   ;;  %s608_s1 = inlined_call_operand.vmem [shape: f32[16,32], index: 1, kind: input, shape index: {}]   ;;  %s609_s2 = inlined_call_operand.vmem [shape: f32[128,16], index: 2, kind: input, shape index: {}]   ;;  %s610_s3 = inlined_call_operand.vmem [shape: f32[1,128], index: 3, kind: input, shape index: {}]   ;;  %s611_s4 = inlined_call_operand.hbm [shape: f32[16,128], index: 4, kind: output, shape index: {}]  }
   0x1   :  { %v24_v0 = vld [vmem:[%s608_s1] sm:$0xff]  ;;  %v25_v1 = vld [vmem:[%s608_s1 + $0x8] sm:$0xff]  ;;  %vm378_vm2 = vmpackc.low %vm26_vm0, %vm26_vm0 }
   0x2   :  { %v22_v2 = vld [vmem:[%s607_s0] sm:$0xff]  ;;  %v377_v3 = vpack.c.bf16 %v25_v1, %v24_v0  ;;  %v120_v5 = vld [vmem:[%s609_s2 + $0x8] sm:$0xff]  ;;  %vm506_vm3 = vmpackc.low %vm114_vm1, %vm114_vm1 }
   0x3   :  { %339 = vmatprep.mubr.msk.f32.mxu0 %vm26_vm0, %v22_v2  ;;  %v119_v4 = vld [vmem:[%s609_s2] sm:$0xff]  ;;  %v121_v7 = vld [vmem:[%s609_s2 + $0x10] sm:$0xff]  ;;  %v122_v9 = vld [vmem:[%s609_s2 + $0x18] sm:$0xff] }
   0x4   :  { %379 = vmatprep.subr.msk.bf16.mxu0 %vm378_vm2, %v377_v3  ;;  %v383_v8 = vpack.c.bf16 %v120_v5, %v119_v4  ;;  %v389_v10 = vpack.c.bf16 %v122_v9, %v121_v7 }
   0x5   :  { %382 = vmatpush3.bf16.xpose.msk.msra.mxu0 %vm378_vm2, %v377_v3 }
   0x6   :  { %385 = vmatprep.subr.msk.bf16.mxu1 %vm506_vm3, %v383_v8 }
   0x7   :  { %388 = vmatpush3.bf16.xpose.msk.msra.mxu1 %vm506_vm3, %v383_v8 }
   0x8   :  { %9 = vsyncpa [#allocation4], 0  ;;  %391 = vmatprep.subr.msk.bf16.mxu1 %vm506_vm3, %v389_v10  ;;  %v23_v11 = vld [vmem:[%s607_s0 + $0x8] sm:$0xff]  ;;  %v123_v12 = vld [vmem:[%s609_s2 + $0x20] sm:$0xff]  ;;  %s458_s27 = smov [#allocation3]  }
   0x9   :  { %v124_v13 = vld [vmem:[%s609_s2 + $0x28] sm:$0xff]  ;;  %v125_v15 = vld [vmem:[%s609_s2 + $0x30] sm:$0xff]  ;;  %v126_v16 = vld [vmem:[%s609_s2 + $0x38] sm:$0xff]  ;;  %s279_s28 = sshll.u32 %s458_s27, 4  ;;  %s280_s28 = int_to_ptr.vmem [resolvable:$true] %s279_s28 }
   0xa   :  { %v395_v14 = vpack.c.bf16 %v124_v13, %v123_v12  ;;  %v401_v17 = vpack.c.bf16 %v126_v16, %v125_v15  ;;  %v127_v18 = vld [vmem:[%s609_s2 + $0x40] sm:$0xff]  ;;  %v128_v19 = vld [vmem:[%s609_s2 + $0x48] sm:$0xff]  ;;  %v129_v21 = vld [vmem:[%s609_s2 + $0x50] sm:$0xff]  ;;  %s434_s29 = scalar_lea.vmem %s280_s28, 256  ;;  %p439_p1 = scmp.lt.s32.totalorder %s280_s28, %s280_s28 }
   0xb   :  { %v407_v20 = vpack.c.bf16 %v128_v19, %v127_v18  ;;  %v130_v22 = vld [vmem:[%s609_s2 + $0x58] sm:$0xff]  ;;  %v131_v24 = vld [vmem:[%s609_s2 + $0x60] sm:$0xff]  ;;  %v132_v25 = vld [vmem:[%s609_s2 + $0x68] sm:$0xff]  ;;  %p435_p0 = scmp.ne.s32.totalorder %s280_s28, %s434_s29  ;;  %p440_p2 = scmp.lt.s32.totalorder %s434_s29, %s434_s29 }
   0xc   :  { %340 = vmatmul.mubr.msk.f32.vlgmr.msra.gmra.mrb[0].mxu0 %vm26_vm0, %v23_v11  ;;  %v413_v23 = vpack.c.bf16 %v130_v22, %v129_v21  ;;  %v419_v26 = vpack.c.bf16 %v132_v25, %v131_v24  ;;  %v133_v27 = vld [vmem:[%s609_s2 + $0x70] sm:$0xff]  ;;  %v134_v28 = vld [vmem:[%s609_s2 + $0x78] sm:$0xff]  ;;  %v294_v34 = vld [vmem:[%s610_s3] ss:$0 sm:$0xff] }
   0xd   :  { %v425_v29 = vpack.c.bf16 %v134_v28, %v133_v27  ;;  %p441_p3 = por %p440_p2, %p439_p1 }
   0xf   :  { %394 = vmatpush3.bf16.xpose.msk.msra.mxu1 %vm506_vm3, %v389_v10  ;;  %p442_p4 = pnand %p441_p3, %p435_p0 }
  0x10   :  { %397 = vmatprep.subr.msk.bf16.mxu1 %vm506_vm3, %v395_v14 }
  0x17   :  { %400 = vmatpush3.bf16.xpose.msk.msra.mxu1 %vm506_vm3, %v395_v14 }
  0x18   :  { %403 = vmatprep.subr.msk.bf16.mxu1 %vm506_vm3, %v401_v17 }
  0x1f   :  { %406 = vmatpush3.bf16.xpose.msk.msra.mxu1 %vm506_vm3, %v401_v17 }
  0x20   :  { %409 = vmatprep.subr.msk.bf16.mxu1 %vm506_vm3, %v407_v20 }
  0x27   :  { %412 = vmatpush3.bf16.xpose.msk.msra.mxu1 %vm506_vm3, %v407_v20 }
  0x28   :  { %415 = vmatprep.subr.msk.bf16.mxu1 %vm506_vm3, %v413_v23 }
  0x2f   :  { %418 = vmatpush3.bf16.xpose.msk.msra.mxu1 %vm506_vm3, %v413_v23 }
  0x30   :  { %421 = vmatprep.subr.msk.bf16.mxu1 %vm506_vm3, %v419_v26 }
  0x37   :  { %424 = vmatpush3.bf16.xpose.msk.msra.mxu1 %vm506_vm3, %v419_v26 }
  0x38   :  { %427 = vmatprep.subr.msk.bf16.mxu1 %vm506_vm3, %v425_v29 }
  0x3f   :  { %430 = vmatpush3.bf16.xpose.msk.msra.mxu1 %vm506_vm3, %v425_v29 }
  0xdf   :  { %v341_v30 = vpop.f32.mrb[0].mxu0 }
  0xe0   :  { %116 = vst.msk [vmem:[#allocation2 + $0x8] sm:$0xff] %vm114_vm1, %v341_v30  ;;  %v105_v31 = vpop.f32.mrb[1].mxu0 }
  0xe1   :  { %115 = vst.msk [vmem:[#allocation2] sm:$0xff] %vm114_vm1, %v105_v31 }
  0xe7   :  { %v118_v33 = vld [vmem:[#allocation2 + $0x8] sm:$0xff] }
  0xe8   :  { %v117_v32 = vld [vmem:[#allocation2] sm:$0xff] }
  0xe9   :  { %374 = vmatprep.mubr.msk.f32.mxu1 %vm114_vm1, %v117_v32 }
  0xea   :  { %375 = vmatmul.mubr.msk.f32.vlgmr.msra.gmra.mrb[0].mxu1 %vm114_vm1, %v118_v33 }
 0x1bd   :  { %v376_v35 = vpop.f32.mrb[0].mxu1 }
 0x1be   :  { %v269_v36 = vadd.f32 %v376_v35, %v294_v34  ;;  %v263_v37 = vpop.f32.mrb[1].mxu1 }
 0x1bf   :  { %v264_v38 = vadd.f32 %v294_v34, %v263_v37 }
 0x1c0   :  { %273 = vst [vmem:[#allocation3 + $0x8] sm:$0xff] %v269_v36 }
 0x1c1   :  { %272 = vst [vmem:[#allocation3] sm:$0xff] %v264_v38 }
 0x1c2   :  { %445 = shalt.err (!%p442_p4)
}
 0x1c3   :  { %s446_s3 = scalar_lea.hbm %s611_s4, 256 }
 0x1c4   :  { %p447_p5 = scmp.ne.s32.totalorder %s611_s4, %s446_s3  ;;  %p450_p6 = scmp.lt.u32.totalorder %s446_s3, %s611_s4 }
 0x1c6   :  { %p452_p7 = pnand %p450_p6, %p447_p5 }
 0x1c8   :  { %455 = shalt.err (!%p452_p7)
}
 0x1c9   :  { %s459_s0 = smov 128   ;;  %s460_s10 = smov 8  }
 0x1ca   :  { %285 = dma.vmem_to_hbm [thread:$0]  %s280_s28, 256, %s611_s4, [#allocation4], %s459_s0, %s459_s0, %s460_s10  }
 0x1cb   :  { %456 = dma.done.wait [#allocation4], 256  }
 0x1cc   :  { %457 = vsyncadd [#allocation4], 4294967040 }
 0x1cd   :  { %289 = vsyncpa [#allocation4], 1 }

</bundles_post_ra>
